<compile_context>
chip_gen: v5e
topology: v5e:2x2
jax: 0.10.0
libtpu: 0.0.40
codegen_flags: <defaults>
</compile_context>

<pallas_src>
import jax
import jax.numpy as jnp
from jax.experimental import pallas as pl
from jax.experimental.pallas import tpu as pltpu

# Natural (PyTorch) feature sizes.
HIDDEN = 312                 # TinyBERT-style hidden size implied by fc1 = Linear(312, 256)
D1, D2, D3, D4 = 256, 100, 32, 1

# Lane-padded sizes (lane axis multiples of 128) used inside the head only.
HIDDEN_PAD = 384             # pooler output lanes
D2_PAD = 128
D3_PAD = 128


def _round_up(x, m):
    return (x + m - 1) // m * m


def _head_kernel(pooled_ref,
                 wp_ref, bp_ref,
                 w1_ref, b1_ref,
                 w2_ref, b2_ref,
                 w3_ref, b3_ref,
                 w4_ref, b4_ref,
                 out_ref):
    f32 = jnp.float32
    bf16 = jnp.bfloat16

    h = pooled_ref[...]                                   # [TB, 312] bf16

    # BERT pooler: cls_hs = tanh(h @ Wp + bp).  Wp is zero-padded 312 -> 384 on
    # the output lanes, so the padded lanes of `cls` are tanh(0) == 0 exactly.
    cls = jnp.tanh(
        jnp.dot(h, wp_ref[...], preferred_element_type=f32) + bp_ref[...])

    # torch.nn.functional.normalize: L2 along dim=1, eps=1e-12.
    # cls padded lanes are exactly zero -> they do not perturb the norm.
    sumsq = jnp.sum(cls * cls, axis=1, keepdims=True)
    cls = cls * jax.lax.rsqrt(jnp.maximum(sumsq, 1e-24))  # == cls / max(||cls||, 1e-12)

    x = jax.nn.sigmoid(
        jnp.dot(cls.astype(bf16), w1_ref[...], preferred_element_type=f32) + b1_ref[...])
    # TODO(synk): nn.Dropout() is identity at inference; no stochastic masking applied.
    x = jax.nn.sigmoid(
        jnp.dot(x.astype(bf16), w2_ref[...], preferred_element_type=f32) + b2_ref[...])
    # NOTE: from here on the padded lanes hold sigmoid(0) == 0.5, NOT zero.  They
    # are harmless only because the padded K-rows of w3 (rows >= 100) and the
    # padded lanes of the fc4 weight row (lanes >= 32) are zero — see
    # pack_params_for_kernel().
    x = jax.nn.sigmoid(
        jnp.dot(x.astype(bf16), w3_ref[...], preferred_element_type=f32) + b3_ref[...])

    # fc4 (32 -> 1): VPU multiply + row reduction instead of an N=1 MXU matmul.
    y = jnp.sum(x * w4_ref[...], axis=1, keepdims=True) + b4_ref[...]
    out_ref[...] = jax.nn.sigmoid(y).astype(out_ref.dtype)   # [TB, 1]


def _choose_batch_tile(B, tb=2048):
    """Sublane-aligned batch tile.  When the batch allows it, aim for an even
    number of grid steps (>= 2) so v7x's two TensorCores both get work, while
    capping the tile at `tb` rows (roughly 11 MiB of activations + weights at
    TB=2048 — well inside v7x's 64 MiB physical VMEM)."""
    B8 = _round_up(max(B, 1), 8)
    if B8 <= 8:
        return 8
    n_tiles = max(2, pl.cdiv(B8, tb))
    if n_tiles % 2:
        n_tiles += 1
    return _round_up(pl.cdiv(B8, n_tiles), 8)


def bert_head_forward(pooled, packed, tb=2048):
    """pooled: [B, 312] (any float dtype; streamed to the kernel as bf16).
    packed: dict of lane-padded kernel weights (see pack_params_for_kernel)."""
    B = pooled.shape[0]
    assert pooled.shape[1] == HIDDEN
    pooled = pooled.astype(jnp.bfloat16)          # halve the dominant HBM stream

    TB = _choose_batch_tile(B, tb)
    grid = (pl.cdiv(B, TB),)                      # ragged last block handled by Mosaic

    def resident(shape):
        # Full-array block with a constant index_map -> stays in VMEM for the
        # whole grid; Buffered(1) because double-buffering a constant block is
        # wasted VMEM + DMA bookkeeping.
        zeros = (0,) * len(shape)
        return pl.BlockSpec(shape, lambda i, z=zeros: z,
                            pipeline_mode=pl.Buffered(1))

    in_specs = [
        pl.BlockSpec((TB, HIDDEN), lambda i: (i, 0)),            # pooled (batch-tiled, bf16)
        resident((HIDDEN, HIDDEN_PAD)),                          # wp (bf16)  [312, 384]
        resident((1, HIDDEN_PAD)),                               # bp (f32)
        resident((HIDDEN_PAD, D1)),                              # w1 (bf16)  [384, 256]
        resident((1, D1)),                                       # b1
        resident((D1, D2_PAD)),                                  # w2 (bf16)  [256, 128]
        resident((1, D2_PAD)),                                   # b2
        resident((D2_PAD, D3_PAD)),                              # w3 (bf16)  [128, 128]
        resident((1, D3_PAD)),                                   # b3
        resident((1, D3_PAD)),                                   # w4 row (f32, VPU path)
        resident((1, 1)),                                        # b4
    ]
    out_spec = pl.BlockSpec((TB, 1), lambda i: (i, 0))

    out = pl.pallas_call(
        _head_kernel,
        out_shape=jax.ShapeDtypeStruct((B, 1), jnp.float32),
        grid=grid,
        in_specs=in_specs,
        out_specs=out_spec,
        compiler_params=pltpu.CompilerParams(
            dimension_semantics=("parallel",),                   # 2-TC batch sharding on v7x
            vmem_limit_bytes=48 * 1024 * 1024),
    )(pooled,
      packed["wp"], packed["bp"],
      packed["w1"], packed["b1"],
      packed["w2"], packed["b2"],
      packed["w3"], packed["b3"],
      packed["w4"], packed["b4"])

    return out                                                   # [B, 1] f32


def init_params(key):
    """Deterministic synthetic parameters matching the PyTorch module shapes
    (weights stored as [in_features, out_features])."""
    keys = jax.random.split(key, 12)

    def lin(kw, kb, fan_in, fan_out):
        bound = 1.0 / jnp.sqrt(jnp.float32(fan_in))
        w = jax.random.uniform(kw, (fan_in, fan_out), jnp.float32, -bound, bound)
        b = jax.random.uniform(kb, (1, fan_out), jnp.float32, -bound, bound)
        return w, b

    wp, bp = lin(keys[0], keys[1], HIDDEN, HIDDEN)   # BERT pooler dense
    w1, b1 = lin(keys[2], keys[3], HIDDEN, D1)       # fc1: 312 -> 256
    w2, b2 = lin(keys[4], keys[5], D1, D2)           # fc2: 256 -> 100
    w3, b3 = lin(keys[6], keys[7], D2, D3)           # fc3: 100 -> 32
    w4, b4 = lin(keys[8], keys[9], D3, D4)           # fc4: 32  -> 1
    vocab = 64
    emb = jax.random.normal(keys[10], (vocab, HIDDEN), jnp.float32) * 0.02
    return {
        "emb": emb,
        "wp": wp, "bp": bp,
        "w1": w1, "b1": b1,
        "w2": w2, "b2": b2,
        "w3": w3, "b3": b3,
        "w4": w4, "b4": b4,
    }


def pack_params_for_kernel(params):
    """Zero-pad lane dims to multiples of 128 and cast matmul weights to bf16.

    Padding invariant (correctness-critical): the padded lanes of the fc2/fc3
    sigmoid outputs are sigmoid(0) == 0.5, NOT zero.  They stay inert only
    because the padded K-rows of w3 (rows >= 100) and the padded lanes of the
    fc4 weight row (lanes >= 32) are zero.  Any repacking must keep the padding
    zero-filled.
    """
    def pad2(a, rows, cols, dtype):
        out = jnp.zeros((rows, cols), dtype)
        return out.at[:a.shape[0], :a.shape[1]].set(a.astype(dtype))

    return {
        "wp": pad2(params["wp"], HIDDEN, HIDDEN_PAD, jnp.bfloat16),   # [312, 384]
        "bp": pad2(params["bp"], 1, HIDDEN_PAD, jnp.float32),
        "w1": pad2(params["w1"], HIDDEN_PAD, D1, jnp.bfloat16),       # [384, 256]
        "b1": params["b1"].astype(jnp.float32),                       # [1, 256]
        "w2": pad2(params["w2"], D1, D2_PAD, jnp.bfloat16),           # [256, 128]
        "b2": pad2(params["b2"], 1, D2_PAD, jnp.float32),
        "w3": pad2(params["w3"], D2_PAD, D3_PAD, jnp.bfloat16),       # [128, 128]
        "b3": pad2(params["b3"], 1, D3_PAD, jnp.float32),
        # fc4 handled on the VPU: weight stored as a (1, 128) f32 row.
        "w4": pad2(params["w4"].T, 1, D3_PAD, jnp.float32),
        "b4": params["b4"].reshape(1, 1).astype(jnp.float32),
    }


def synthetic_bert_body(sent_id, mask, emb):
    """Deterministic stand-in for the pretrained BERT body (plain-JAX glue):
    token embedding lookup + attention-masked mean pooling -> [B, HIDDEN]."""
    # TODO(synk): fuse this pooling (gather via scalar-prefetched token ids)
    # into the head pallas_call to remove the [B, 312] HBM round trip + launch.
    tok = jnp.take(emb, sent_id, axis=0)                 # [B, S, HIDDEN]
    m = mask.astype(jnp.float32)[..., None]              # [B, S, 1]
    pooled = jnp.sum(tok * m, axis=1) / jnp.maximum(jnp.sum(m, axis=1), 1.0)
    return pooled                                        # [B, HIDDEN] f32


def bert_architecture_forward(sent_id, mask, params, packed):
    pooled = synthetic_bert_body(sent_id, mask, params["emb"])
    return bert_head_forward(pooled, packed)


if __name__ == "__main__":
    key = jax.random.PRNGKey(0)
    kp, kid, kmask = jax.random.split(key, 3)

    params = init_params(kp)
    packed = pack_params_for_kernel(params)

    B, S = 2, 8
    sent_id = jax.random.randint(kid, (B, S), 0, 64, dtype=jnp.int32)
    # attention mask: first few tokens valid
    lengths = jnp.array([8, 5], dtype=jnp.int32)
    mask = (jnp.arange(S)[None, :] < lengths[:, None]).astype(jnp.int32)

    out = bert_architecture_forward(sent_id, mask, params, packed)
    out = jax.block_until_ready(out)
    assert out.shape == (B, 1) and out.dtype == jnp.float32
    assert bool(jnp.all(jnp.isfinite(out)))
    assert bool(jnp.all((out >= 0.0) & (out <= 1.0)))    # sigmoid output range
    print("KERNEL_OK")
</pallas_src>

<mosaic_0001>
module attributes {stable_mosaic.version = 11 : i64} {
  func.func @_head_kernel(%arg0: i32, %arg1: memref<8x312xbf16, #tpu.memory_space<vmem>>, %arg2: memref<312x384xbf16, #tpu.memory_space<vmem>>, %arg3: memref<1x384xf32, #tpu.memory_space<vmem>>, %arg4: memref<384x256xbf16, #tpu.memory_space<vmem>>, %arg5: memref<1x256xf32, #tpu.memory_space<vmem>>, %arg6: memref<256x128xbf16, #tpu.memory_space<vmem>>, %arg7: memref<1x128xf32, #tpu.memory_space<vmem>>, %arg8: memref<128x128xbf16, #tpu.memory_space<vmem>>, %arg9: memref<1x128xf32, #tpu.memory_space<vmem>>, %arg10: memref<1x128xf32, #tpu.memory_space<vmem>>, %arg11: memref<1x1xf32, #tpu.memory_space<vmem>>, %arg12: memref<8x1xf32, #tpu.memory_space<vmem>>) attributes {dimension_semantics = [#tpu.dimension_semantics<parallel>], iteration_bounds = array<i64: 1>, scalar_prefetch = 0 : i64, scratch_operands = 0 : i64, tpu.core_type = #tpu.core_type<tc>, window_params = [{transform_indices = @transform_0, window_bounds = array<i64: 8, 312>}, {pipeline_mode = #tpu.pipeline_mode<synchronous>, transform_indices = @transform_1, window_bounds = array<i64: 312, 384>}, {pipeline_mode = #tpu.pipeline_mode<synchronous>, transform_indices = @transform_2, window_bounds = array<i64: 1, 384>}, {pipeline_mode = #tpu.pipeline_mode<synchronous>, transform_indices = @transform_3, window_bounds = array<i64: 384, 256>}, {pipeline_mode = #tpu.pipeline_mode<synchronous>, transform_indices = @transform_4, window_bounds = array<i64: 1, 256>}, {pipeline_mode = #tpu.pipeline_mode<synchronous>, transform_indices = @transform_5, window_bounds = array<i64: 256, 128>}, {pipeline_mode = #tpu.pipeline_mode<synchronous>, transform_indices = @transform_6, window_bounds = array<i64: 1, 128>}, {pipeline_mode = #tpu.pipeline_mode<synchronous>, transform_indices = @transform_7, window_bounds = array<i64: 128, 128>}, {pipeline_mode = #tpu.pipeline_mode<synchronous>, transform_indices = @transform_8, window_bounds = array<i64: 1, 128>}, {pipeline_mode = #tpu.pipeline_mode<synchronous>, transform_indices = @transform_9, window_bounds = array<i64: 1, 128>}, {pipeline_mode = #tpu.pipeline_mode<synchronous>, transform_indices = @transform_10, window_bounds = array<i64: 1, 1>}, {transform_indices = @transform_11, window_bounds = array<i64: 8, 1>}]} {
    %c0 = arith.constant 0 : index
    %c0_0 = arith.constant 0 : index
    %0 = vector.load %arg1[%c0, %c0_0] : memref<8x312xbf16, #tpu.memory_space<vmem>>, vector<8x312xbf16>
    %c0_1 = arith.constant 0 : index
    %c0_2 = arith.constant 0 : index
    %1 = vector.load %arg2[%c0_1, %c0_2] : memref<312x384xbf16, #tpu.memory_space<vmem>>, vector<312x384xbf16>
    %cst = arith.constant dense<0.000000e+00> : vector<8x384xf32>
    %2 = tpu.matmul %0, %1, %cst {dimension_numbers = #tpu.dot_dimension_numbers<[1], [0], [0], [1], [0, 0, 1, 1], [], []>} : vector<8x312xbf16>, vector<312x384xbf16>, vector<8x384xf32> -> vector<8x384xf32>
    %c0_3 = arith.constant 0 : index
    %c0_4 = arith.constant 0 : index
    %3 = vector.load %arg3[%c0_3, %c0_4] : memref<1x384xf32, #tpu.memory_space<vmem>>, vector<1x384xf32>
    %4 = vector.broadcast %3 : vector<1x384xf32> to vector<8x384xf32>
    %5 = arith.addf %2, %4 : vector<8x384xf32>
    %6 = math.tanh %5 : vector<8x384xf32>
    %7 = arith.mulf %6, %6 : vector<8x384xf32>
    %cst_5 = arith.constant dense<0.000000e+00> : vector<8xf32>
    %8 = vector.multi_reduction <add>, %7, %cst_5 [1] : vector<8x384xf32> to vector<8xf32>
    %9 = vector.shape_cast %8 : vector<8xf32> to vector<8x1xf32>
    %cst_6 = arith.constant 1.000000e-24 : f32
    %10 = vector.broadcast %cst_6 : f32 to vector<8x1xf32>
    %11 = arith.maximumf %9, %10 : vector<8x1xf32>
    %12 = math.rsqrt %11 : vector<8x1xf32>
    %13 = vector.broadcast %12 : vector<8x1xf32> to vector<8x384xf32>
    %14 = arith.mulf %6, %13 : vector<8x384xf32>
    %15 = arith.truncf %14 : vector<8x384xf32> to vector<8x384xbf16>
    %c0_7 = arith.constant 0 : index
    %c0_8 = arith.constant 0 : index
    %16 = vector.load %arg4[%c0_7, %c0_8] : memref<384x256xbf16, #tpu.memory_space<vmem>>, vector<384x256xbf16>
    %cst_9 = arith.constant dense<0.000000e+00> : vector<8x256xf32>
    %17 = tpu.matmul %15, %16, %cst_9 {dimension_numbers = #tpu.dot_dimension_numbers<[1], [0], [0], [1], [0, 0, 1, 1], [], []>} : vector<8x384xbf16>, vector<384x256xbf16>, vector<8x256xf32> -> vector<8x256xf32>
    %c0_10 = arith.constant 0 : index
    %c0_11 = arith.constant 0 : index
    %18 = vector.load %arg5[%c0_10, %c0_11] : memref<1x256xf32, #tpu.memory_space<vmem>>, vector<1x256xf32>
    %19 = vector.broadcast %18 : vector<1x256xf32> to vector<8x256xf32>
    %20 = arith.addf %17, %19 : vector<8x256xf32>
    %21 = arith.negf %20 : vector<8x256xf32>
    %22 = math.exp %21 : vector<8x256xf32>
    %cst_12 = arith.constant 1.000000e+00 : f32
    %23 = vector.broadcast %cst_12 : f32 to vector<8x256xf32>
    %24 = arith.addf %23, %22 : vector<8x256xf32>
    %25 = arith.divf %23, %24 : vector<8x256xf32>
    %26 = arith.truncf %25 : vector<8x256xf32> to vector<8x256xbf16>
    %c0_13 = arith.constant 0 : index
    %c0_14 = arith.constant 0 : index
    %27 = vector.load %arg6[%c0_13, %c0_14] : memref<256x128xbf16, #tpu.memory_space<vmem>>, vector<256x128xbf16>
    %cst_15 = arith.constant dense<0.000000e+00> : vector<8x128xf32>
    %28 = tpu.matmul %26, %27, %cst_15 {dimension_numbers = #tpu.dot_dimension_numbers<[1], [0], [0], [1], [0, 0, 1, 1], [], []>} : vector<8x256xbf16>, vector<256x128xbf16>, vector<8x128xf32> -> vector<8x128xf32>
    %c0_16 = arith.constant 0 : index
    %c0_17 = arith.constant 0 : index
    %29 = vector.load %arg7[%c0_16, %c0_17] : memref<1x128xf32, #tpu.memory_space<vmem>>, vector<1x128xf32>
    %30 = vector.broadcast %29 : vector<1x128xf32> to vector<8x128xf32>
    %31 = arith.addf %28, %30 : vector<8x128xf32>
    %32 = arith.negf %31 : vector<8x128xf32>
    %33 = math.exp %32 : vector<8x128xf32>
    %cst_18 = arith.constant 1.000000e+00 : f32
    %34 = vector.broadcast %cst_18 : f32 to vector<8x128xf32>
    %35 = arith.addf %34, %33 : vector<8x128xf32>
    %36 = arith.divf %34, %35 : vector<8x128xf32>
    %37 = arith.truncf %36 : vector<8x128xf32> to vector<8x128xbf16>
    %c0_19 = arith.constant 0 : index
    %c0_20 = arith.constant 0 : index
    %38 = vector.load %arg8[%c0_19, %c0_20] : memref<128x128xbf16, #tpu.memory_space<vmem>>, vector<128x128xbf16>
    %cst_21 = arith.constant dense<0.000000e+00> : vector<8x128xf32>
    %39 = tpu.matmul %37, %38, %cst_21 {dimension_numbers = #tpu.dot_dimension_numbers<[1], [0], [0], [1], [0, 0, 1, 1], [], []>} : vector<8x128xbf16>, vector<128x128xbf16>, vector<8x128xf32> -> vector<8x128xf32>
    %c0_22 = arith.constant 0 : index
    %c0_23 = arith.constant 0 : index
    %40 = vector.load %arg9[%c0_22, %c0_23] : memref<1x128xf32, #tpu.memory_space<vmem>>, vector<1x128xf32>
    %41 = vector.broadcast %40 : vector<1x128xf32> to vector<8x128xf32>
    %42 = arith.addf %39, %41 : vector<8x128xf32>
    %43 = arith.negf %42 : vector<8x128xf32>
    %44 = math.exp %43 : vector<8x128xf32>
    %cst_24 = arith.constant 1.000000e+00 : f32
    %45 = vector.broadcast %cst_24 : f32 to vector<8x128xf32>
    %46 = arith.addf %45, %44 : vector<8x128xf32>
    %47 = arith.divf %45, %46 : vector<8x128xf32>
    %c0_25 = arith.constant 0 : index
    %c0_26 = arith.constant 0 : index
    %48 = vector.load %arg10[%c0_25, %c0_26] : memref<1x128xf32, #tpu.memory_space<vmem>>, vector<1x128xf32>
    %49 = vector.broadcast %48 : vector<1x128xf32> to vector<8x128xf32>
    %50 = arith.mulf %47, %49 : vector<8x128xf32>
    %cst_27 = arith.constant dense<0.000000e+00> : vector<8xf32>
    %51 = vector.multi_reduction <add>, %50, %cst_27 [1] : vector<8x128xf32> to vector<8xf32>
    %52 = vector.shape_cast %51 : vector<8xf32> to vector<8x1xf32>
    %c0_28 = arith.constant 0 : index
    %c0_29 = arith.constant 0 : index
    %53 = vector.load %arg11[%c0_28, %c0_29] : memref<1x1xf32, #tpu.memory_space<vmem>>, vector<1x1xf32>
    %54 = vector.broadcast %53 : vector<1x1xf32> to vector<8x1xf32>
    %55 = arith.addf %52, %54 : vector<8x1xf32>
    %56 = arith.negf %55 : vector<8x1xf32>
    %57 = math.exp %56 : vector<8x1xf32>
    %cst_30 = arith.constant 1.000000e+00 : f32
    %58 = vector.broadcast %cst_30 : f32 to vector<8x1xf32>
    %59 = arith.addf %58, %57 : vector<8x1xf32>
    %60 = arith.divf %58, %59 : vector<8x1xf32>
    %c0_31 = arith.constant 0 : index
    %c0_32 = arith.constant 0 : index
    %61 = vector.load %arg12[%c0_31, %c0_32] : memref<8x1xf32, #tpu.memory_space<vmem>>, vector<8x1xf32>
    tpu.vector_store %arg12[%c0_31, %c0_32], %60 {strides = array<i32>} : memref<8x1xf32, #tpu.memory_space<vmem>>, vector<8x1xf32>,
    return
  }
  func.func @transform_0(%arg0: i32) -> (i32, i32) {
    %c0_i32 = arith.constant 0 : i32
    %c0_i32_0 = arith.constant 0 : i32
    return %arg0, %c0_i32 : i32, i32
  }
  func.func @transform_1(%arg0: i32) -> (i32, i32) {
    %c0_i32 = arith.constant 0 : i32
    %c0_i32_0 = arith.constant 0 : i32
    %c0_i32_1 = arith.constant 0 : i32
    return %c0_i32, %c0_i32_0 : i32, i32
  }
  func.func @transform_2(%arg0: i32) -> (i32, i32) {
    %c0_i32 = arith.constant 0 : i32
    %c0_i32_0 = arith.constant 0 : i32
    %c0_i32_1 = arith.constant 0 : i32
    return %c0_i32, %c0_i32_0 : i32, i32
  }
  func.func @transform_3(%arg0: i32) -> (i32, i32) {
    %c0_i32 = arith.constant 0 : i32
    %c0_i32_0 = arith.constant 0 : i32
    %c0_i32_1 = arith.constant 0 : i32
    return %c0_i32, %c0_i32_0 : i32, i32
  }
  func.func @transform_4(%arg0: i32) -> (i32, i32) {
    %c0_i32 = arith.constant 0 : i32
    %c0_i32_0 = arith.constant 0 : i32
    %c0_i32_1 = arith.constant 0 : i32
    return %c0_i32, %c0_i32_0 : i32, i32
  }
  func.func @transform_5(%arg0: i32) -> (i32, i32) {
    %c0_i32 = arith.constant 0 : i32
    %c0_i32_0 = arith.constant 0 : i32
    %c0_i32_1 = arith.constant 0 : i32
    return %c0_i32, %c0_i32_0 : i32, i32
  }
  func.func @transform_6(%arg0: i32) -> (i32, i32) {
    %c0_i32 = arith.constant 0 : i32
    %c0_i32_0 = arith.constant 0 : i32
    %c0_i32_1 = arith.constant 0 : i32
    return %c0_i32, %c0_i32_0 : i32, i32
  }
  func.func @transform_7(%arg0: i32) -> (i32, i32) {
    %c0_i32 = arith.constant 0 : i32
    %c0_i32_0 = arith.constant 0 : i32
    %c0_i32_1 = arith.constant 0 : i32
    return %c0_i32, %c0_i32_0 : i32, i32
  }
  func.func @transform_8(%arg0: i32) -> (i32, i32) {
    %c0_i32 = arith.constant 0 : i32
    %c0_i32_0 = arith.constant 0 : i32
    %c0_i32_1 = arith.constant 0 : i32
    return %c0_i32, %c0_i32_0 : i32, i32
  }
  func.func @transform_9(%arg0: i32) -> (i32, i32) {
    %c0_i32 = arith.constant 0 : i32
    %c0_i32_0 = arith.constant 0 : i32
    %c0_i32_1 = arith.constant 0 : i32
    return %c0_i32, %c0_i32_0 : i32, i32
  }
  func.func @transform_10(%arg0: i32) -> (i32, i32) {
    %c0_i32 = arith.constant 0 : i32
    %c0_i32_0 = arith.constant 0 : i32
    %c0_i32_1 = arith.constant 0 : i32
    return %c0_i32, %c0_i32_0 : i32, i32
  }
  func.func @transform_11(%arg0: i32) -> (i32, i32) {
    %c0_i32 = arith.constant 0 : i32
    %c0_i32_0 = arith.constant 0 : i32
    return %arg0, %c0_i32 : i32, i32
  }
}

</mosaic_0001>

<bundles_post_ra>
// kernel: tpu_custom_call.1
= control target key start
LH: loop header
LB: loop body
LE: loop exit
PB: predicated region body
PF: predicated region fallthrough
CT: control target
= control target key end

     0   :  { %s2442_s0 = inlined_call_operand.hbm [shape: bf16[2,312], index: 0, kind: input, shape index: {}]   ;;  %s2443_s1 = inlined_call_operand.hbm [shape: bf16[312,384], index: 1, kind: input, shape index: {}]   ;;  %s2444_s2 = inlined_call_operand.vmem [shape: f32[1,384], index: 2, kind: input, shape index: {}]   ;;  %s2445_s3 = inlined_call_operand.hbm [shape: bf16[384,256], index: 3, kind: input, shape index: {}]   ;;  %s2446_s4 = inlined_call_operand.vmem [shape: f32[1,256], index: 4, kind: input, shape index: {}]   ;;  %s2447_s5 = inlined_call_operand.hbm [shape: bf16[256,128], index: 5, kind: input, shape index: {}]   ;;  %s2448_s6 = inlined_call_operand.vmem [shape: f32[1,128], index: 6, kind: input, shape index: {}]   ;;  %s2449_s7 = inlined_call_operand.hbm [shape: bf16[128,128], index: 7, kind: input, shape index: {}]   ;;  %s2450_s8 = inlined_call_operand.vmem [shape: f32[1,128], index: 8, kind: input, shape index: {}]   ;;  %s2451_s9 = inlined_call_operand.vmem [shape: f32[1,128], index: 9, kind: input, shape index: {}]   ;;  %s2452_s10 = inlined_call_operand.<no memory space> [shape: f32[1,1], index: 10, kind: input, shape index: {}]   ;;  %s2453_s11 = inlined_call_operand.vmem [shape: f32[2,1], index: 11, kind: output, shape index: {}]  }
   0x1   :  { %v16_v0 = vstv %s2452_s10 }
   0x2   :  { %17 = vst [vmem:[#allocation2] sm:$0x1] %v16_v0 }
   0x3   :  { %18 = vsyncpa [#allocation4], 0 }
   0x4   :  { %19 = vsyncpa [#allocation6], 0 }
   0x5   :  { %20 = vsyncpa [#allocation9], 0  ;;  %s38_s21 = sshll.u32 %s2443_s1, 4  ;;  %s39_s21 = int_to_ptr.hbm [resolvable:$true] %s38_s21 }
   0x6   :  { %24 = vsyncadd [#allocation4], 144  ;;  %s2285_s22 = smov [#allocation5]   ;;  %s68_s26 = sshll.u32 %s2447_s5, 4  ;;  %s69_s26 = int_to_ptr.hbm [resolvable:$true] %s68_s26 }
   0x7   :  { %s40_s23 = sshll.u32 %s2285_s22, 4  ;;  %s2286_s27 = smov 192   ;;  %s41_s23 = int_to_ptr.vmem [resolvable:$true] %s40_s23 }
   0x8   :  { %s2287_s28 = smov 12   ;;  %s2288_s10 = smov [#allocation8]  }
   0x9   :  { %46 = dma.hbm_to_vmem [thread:$0]  %s39_s21, 7488, %s41_s23, [#allocation6], %s2286_s27, %s2286_s27, %s2287_s28  }
   0xa   :  { %s70_s29 = sshll.u32 %s2288_s10, 4  ;;  %s2289_s30 = smov 64   ;;  %s71_s29 = int_to_ptr.vmem [resolvable:$true] %s70_s29 }
   0xb   :  { %s2290_s12 = smov 4   ;;  %s25_s14 = sshll.u32 %s2442_s0, 4  ;;  %s26_s14 = int_to_ptr.hbm [resolvable:$true] %s25_s14 }
   0xc   :  { %76 = dma.hbm_to_vmem [thread:$0]  %s69_s26, 2048, %s71_s29, [#allocation9], %s2289_s30, %s2289_s30, %s2290_s12  }
   0xd   :  { %s2291_s15 = smov [#allocation3]   ;;  %s53_s18 = sshll.u32 %s2445_s3, 4  ;;  %s54_s18 = int_to_ptr.hbm [resolvable:$true] %s53_s18 }
   0xe   :  { %s27_s16 = sshll.u32 %s2291_s15, 4  ;;  %s2292_s19 = smov 48   ;;  %s28_s16 = int_to_ptr.vmem [resolvable:$true] %s27_s16 }
   0xf   :  { %s2293_s20 = smov 3   ;;  %s2294_s21 = smov [#allocation7]  }
  0x10   :  { %33 = dma.hbm_to_vmem [thread:$0]  %s26_s14, 48, %s28_s16, [#allocation4], %s2292_s19, %s2292_s19, %s2293_s20  }
  0x11   :  { %s55_s22 = sshll.u32 %s2294_s21, 4  ;;  %s2295_s23 = smov 128   ;;  %s56_s22 = int_to_ptr.vmem [resolvable:$true] %s55_s22 }
  0x12   :  { %s2296_s24 = smov 8   ;;  %s83_s26 = sshll.u32 %s2449_s7, 4  ;;  %s84_s26 = int_to_ptr.hbm [resolvable:$true] %s83_s26 }
  0x13   :  { %61 = dma.hbm_to_vmem [thread:$0]  %s54_s18, 6144, %s56_s22, [#allocation6], %s2295_s23, %s2295_s23, %s2296_s24  }
  0x14   :  { %s2297_s27 = smov [#allocation10]  }
  0x15   :  { %s85_s28 = sshll.u32 %s2297_s27, 4  ;;  %s86_s28 = int_to_ptr.vmem [resolvable:$true] %s85_s28 }
  0x16   :  { %91 = dma.hbm_to_vmem [thread:$0]  %s84_s26, 1024, %s86_s28, [#allocation9], %s2289_s30, %s2289_s30, %s2290_s12  }
  0x17   :  { %2279 = dma.done.wait [#allocation4], 192  }
  0x18   :  { %2280 = vsyncadd [#allocation4], 4294967104 }
  0x19   :  { %2281 = dma.done.wait [#allocation6], 13632  }
  0x1a   :  { %2282 = vsyncadd [#allocation6], 4294953664 }
  0x1b   :  { %2283 = dma.done.wait [#allocation9], 3072  }
  0x1c   :  { %2284 = vsyncadd [#allocation9], 4294964224  ;;  %v1547_v1 = vld [vmem:[#allocation5 + $0xa8] sm:$0xf]  ;;  %v2007_v2 = vld [vmem:[#allocation5 + $0xb0] sm:$0xf0] }
  0x1d   :  { %v1643_v3 = vld [vmem:[#allocation5 + $0x168] sm:$0xf]  ;;  %v1548_v4 = vor.u32 %v2007_v2, %v1547_v1  ;;  %v2031_v5 = vld [vmem:[#allocation5 + $0x170] sm:$0xf0]  ;;  %v2006_v6 = vld [vmem:[#allocation5 + $0xac] sm:$0xf] }
  0x1e   :  { %v1549_v7 = vld [vmem:[#allocation5 + $0xb4] sm:$0xf0]  ;;  %v1644_v8 = vor.u32 %v2031_v5, %v1643_v3  ;;  %v2376_v10 = vld [vmem:[#allocation5 + $0x1c8] sm:$0xff]  ;;  %vm540_vm0 = vcmask 1043456   ;;  %v1535_v11 = vld [vmem:[#allocation5 + $0x90] sm:$0xf] }
  0x1f   :  { %v1552_v9 = vor.u32 %v2006_v6, %v1549_v7  ;;  %v2004_v12 = vld [vmem:[#allocation5 + $0x98] sm:$0xf0]  ;;  %550 = vmatpush.bf16.msra.mxu0 %v1548_v4  ;;  %v417_v13 = vunpack.c.l.b16 %v2376_v10  ;;  %v1631_v15 = vld [vmem:[#allocation5 + $0x150] sm:$0xf]  ;;  %v2003_v17 = vld [vmem:[#allocation5 + $0x94] sm:$0xf] }
  0x20   :  { %v1536_v14 = vor.u32 %v2004_v12, %v1535_v11  ;;  %v2028_v16 = vld [vmem:[#allocation5 + $0x158] sm:$0xf0]  ;;  %563 = vmatpush.bf16.msra.mxu1 %v1644_v8  ;;  %v1537_v19 = vld [vmem:[#allocation5 + $0x9c] sm:$0xf0]  ;;  %v1679_v20 = vld [vmem:[#allocation5 + $0x1b0] sm:$0xf] }
  0x21   :  { %589 = vmatpush.bf16.msra.mxu3 %v1552_v9  ;;  %v1632_v18 = vor.u32 %v2028_v16, %v1631_v15  ;;  %v2040_v21 = vld [vmem:[#allocation5 + $0x1b8] sm:$0xf0]  ;;  %v477_v22 = vpack.c.b16 %v417_v13, %v417_v13  ;;  %v1540_v23 = vor.u32 %v2003_v17, %v1537_v19  ;;  %v1523_v24 = vld [vmem:[#allocation5 + $0x78] sm:$0xf]  ;;  %v2001_v25 = vld [vmem:[#allocation5 + $0x80] sm:$0xf0]  ;;  %v418_v19 = vunpack.c.h.b16 %v2376_v10 }
  0x22   :  { %v1619_v26 = vld [vmem:[#allocation5 + $0x138] sm:$0xf]  ;;  %v2025_v27 = vld [vmem:[#allocation5 + $0x140] sm:$0xf0]  ;;  %v2000_v28 = vld [vmem:[#allocation5 + $0x7c] sm:$0xf]  ;;  %v1524_v31 = vor.u32 %v2001_v25, %v1523_v24  ;;  %v1680_v32 = vor.u32 %v2040_v21, %v1679_v20 }
  0x23   :  { %v1525_v29 = vld [vmem:[#allocation5 + $0x84] sm:$0xf0]  ;;  %v542_v30 = vsel %vm540_vm0, %v477_v22, 0  ;;  %551 = vmatpush.bf16.msra.mxu0 %v1536_v14  ;;  %v1620_v33 = vor.u32 %v2025_v27, %v1619_v26  ;;  %v1667_v34 = vld [vmem:[#allocation5 + $0x198] sm:$0xf]  ;;  %vm537_vm1 = vcmask 457728  }
  0x24   :  { %580 = vmatpush.bf16.msra.mxu2 %v542_v30  ;;  %564 = vmatpush.bf16.msra.mxu1 %v1632_v18  ;;  %v1511_v35 = vld [vmem:[#allocation5 + $0x60] sm:$0xf]  ;;  %v1998_v36 = vld [vmem:[#allocation5 + $0x68] sm:$0xf0]  ;;  %v1528_v37 = vor.u32 %v2000_v28, %v1525_v29  ;;  %v2037_v38 = vld [vmem:[#allocation5 + $0x1a0] sm:$0xf0] }
  0x25   :  { %590 = vmatpush.bf16.msra.mxu3 %v1540_v23  ;;  %v1607_v39 = vld [vmem:[#allocation5 + $0x120] sm:$0xf]  ;;  %v2022_v40 = vld [vmem:[#allocation5 + $0x128] sm:$0xf0]  ;;  %v1997_v41 = vld [vmem:[#allocation5 + $0x64] sm:$0xf]  ;;  %v1512_v43 = vor.u32 %v1998_v36, %v1511_v35  ;;  %v1668_v45 = vor.u32 %v2037_v38, %v1667_v34  ;;  %v478_v35 = vpack.c.b16 %v418_v19, %v418_v19 }
  0x26   :  { %v1513_v42 = vld [vmem:[#allocation5 + $0x6c] sm:$0xf0]  ;;  %v1655_v44 = vld [vmem:[#allocation5 + $0x180] sm:$0xf]  ;;  %v1608_v46 = vor.u32 %v2022_v40, %v1607_v39  ;;  %v2034_v47 = vld [vmem:[#allocation5 + $0x188] sm:$0xf0] }
  0x27   :  { %552 = vmatpush.bf16.msra.mxu0 %v1524_v31  ;;  %v1499_v48 = vld [vmem:[#allocation5 + $0x48] sm:$0xf]  ;;  %v1995_v49 = vld [vmem:[#allocation5 + $0x50] sm:$0xf0]  ;;  %v1516_v50 = vor.u32 %v1997_v41, %v1513_v42  ;;  %v1994_v53 = vld [vmem:[#allocation5 + $0x4c] sm:$0xf]  ;;  %v1656_v58 = vor.u32 %v2034_v47, %v1655_v44 }
  0x28   :  { %581 = vmatpush.bf16.msra.mxu2 %v1680_v32  ;;  %565 = vmatpush.bf16.msra.mxu1 %v1620_v33  ;;  %v1595_v51 = vld [vmem:[#allocation5 + $0x108] sm:$0xf]  ;;  %v2019_v52 = vld [vmem:[#allocation5 + $0x110] sm:$0xf0]  ;;  %v1501_v54 = vld [vmem:[#allocation5 + $0x54] sm:$0xf0]  ;;  %v1500_v57 = vor.u32 %v1995_v49, %v1499_v48 }
  0x29   :  { %591 = vmatpush.bf16.msra.mxu3 %v1528_v37  ;;  %v2030_v55 = vld [vmem:[#allocation5 + $0x16c] sm:$0xf]  ;;  %v1645_v56 = vld [vmem:[#allocation5 + $0x174] sm:$0xf0]  ;;  %v1596_v59 = vor.u32 %v2019_v52, %v1595_v51  ;;  %v1487_v60 = vld [vmem:[#allocation5 + $0x30] sm:$0xf]  ;;  %v1504_v62 = vor.u32 %v1994_v53, %v1501_v54 }
  0x2a   :  { %v1992_v61 = vld [vmem:[#allocation5 + $0x38] sm:$0xf0]  ;;  %v1648_v63 = vor.u32 %v2030_v55, %v1645_v56  ;;  %v1583_v0 = vld [vmem:[#allocation5 + $0xf0] sm:$0xf]  ;;  %v1991_v2 = vld [vmem:[#allocation5 + $0x34] sm:$0xf] }
  0x2b   :  { %553 = vmatpush.bf16.msra.mxu0 %v1512_v43  ;;  %v2016_v1 = vld [vmem:[#allocation5 + $0xf8] sm:$0xf0]  ;;  %v1489_v3 = vld [vmem:[#allocation5 + $0x3c] sm:$0xf0]  ;;  %v2027_v4 = vld [vmem:[#allocation5 + $0x154] sm:$0xf]  ;;  %v1488_v6 = vor.u32 %v1992_v61, %v1487_v60 }
  0x2c   :  { %582 = vmatpush.bf16.msra.mxu2 %v1668_v45  ;;  %566 = vmatpush.bf16.msra.mxu1 %v1608_v46  ;;  %v1633_v5 = vld [vmem:[#allocation5 + $0x15c] sm:$0xf0]  ;;  %v1475_v7 = vld [vmem:[#allocation5 + $0x18] sm:$0xf]  ;;  %v1989_v8 = vld [vmem:[#allocation5 + $0x20] sm:$0xf0]  ;;  %v1584_v9 = vor.u32 %v2016_v1, %v1583_v0  ;;  %v1492_v14 = vor.u32 %v1991_v2, %v1489_v3 }
  0x2d   :  { %592 = vmatpush.bf16.msra.mxu3 %v1516_v50  ;;  %v1571_v11 = vld [vmem:[#allocation5 + $0xd8] sm:$0xf]  ;;  %v2013_v12 = vld [vmem:[#allocation5 + $0xe0] sm:$0xf0]  ;;  %v1988_v13 = vld [vmem:[#allocation5 + $0x1c] sm:$0xf]  ;;  %v1636_v15 = vor.u32 %v2027_v4, %v1633_v5  ;;  %v1476_v23 = vor.u32 %v1989_v8, %v1475_v7 }
  0x2e   :  { %v1477_v16 = vld [vmem:[#allocation5 + $0x24] sm:$0xf0]  ;;  %v2024_v17 = vld [vmem:[#allocation5 + $0x13c] sm:$0xf]  ;;  %v1463_v20 = vld [vmem:[#allocation5] sm:$0xf]  ;;  %v1572_v28 = vor.u32 %v2013_v12, %v1571_v11 }
  0x2f   :  { %554 = vmatpush.bf16.msra.mxu0 %v1500_v57  ;;  %v1621_v18 = vld [vmem:[#allocation5 + $0x144] sm:$0xf0]  ;;  %v1986_v21 = vld [vmem:[#allocation5 + $0x8] sm:$0xf0]  ;;  %v119_v22 = vld [vmem:[#allocation3] sm:$0x7]  ;;  %v1480_v32 = vor.u32 %v1988_v13, %v1477_v16 }
  0x30   :  { %583 = vmatpush.bf16.msra.mxu2 %v1656_v58  ;;  %567 = vmatpush.bf16.msra.mxu1 %v1596_v59  ;;  %v1559_v24 = vld [vmem:[#allocation5 + $0xc0] sm:$0xf]  ;;  %v2010_v25 = vld [vmem:[#allocation5 + $0xc8] sm:$0xf0]  ;;  %v120_v26 = vld [vmem:[#allocation3 + $0x3] sm:$0x7]  ;;  %v1624_v33 = vor.u32 %v2024_v17, %v1621_v18  ;;  %v1464_v38 = vor.u32 %v1986_v21, %v1463_v20 }
  0x31   :  { %593 = vmatpush.bf16.msra.mxu3 %v1504_v62  ;;  %v121_v27 = vld [vmem:[#allocation3 + $0x6] sm:$0x7]  ;;  %v1985_v29 = vld [vmem:[#allocation5 + $0x4] sm:$0xf]  ;;  %v1465_v30 = vld [vmem:[#allocation5 + $0xc] sm:$0xf0]  ;;  %v1560_v41 = vor.u32 %v2010_v25, %v1559_v24 }
  0x32   :  { %v122_v31 = vld [vmem:[#allocation3 + $0x9] sm:$0x7]  ;;  %210 = vst [vmem:[#allocation1] ss:$9 sm:$0xff] %v119_v22  ;;  %v2021_v10 = vld [vmem:[#allocation5 + $0x124] sm:$0xf]  ;;  %v1468_v42 = vor.u32 %v1985_v29, %v1465_v30 }
  0x33   :  { %555 = vmatpush.bf16.msra.mxu0 %v1488_v6  ;;  %v1609_v34 = vld [vmem:[#allocation5 + $0x12c] sm:$0xf0]  ;;  %213 = vst [vmem:[#allocation1 + $0x1] ss:$9 sm:$0xff] %v120_v26  ;;  %v2008_v37 = vld [vmem:[#allocation5 + $0xb8] sm:$0xf0] }
  0x34   :  { %602 = vmatpush.bf16.msrb.mxu2 %v1648_v63  ;;  %568 = vmatpush.bf16.msra.mxu1 %v1584_v9  ;;  %v1555_v36 = vld [vmem:[#allocation5 + $0xb0] sm:$0xf]  ;;  %216 = vst [vmem:[#allocation1 + $0x2] ss:$9 sm:$0xff] %v121_v27  ;;  %v2032_v40 = vld [vmem:[#allocation5 + $0x178] sm:$0xf0]  ;;  %v1612_v43 = vor.u32 %v2021_v10, %v1609_v34 }
  0x35   :  { %594 = vmatpush.bf16.msra.mxu3 %v1492_v14  ;;  %v1651_v39 = vld [vmem:[#allocation5 + $0x170] sm:$0xf]  ;;  %219 = vst [vmem:[#allocation1 + $0x3] ss:$9 sm:$0xff] %v122_v31  ;;  %v545_v44 = vsel %vm540_vm0, %v478_v35, 0  ;;  %v1556_v47 = vor.u32 %v2008_v37, %v1555_v36 }
  0x36   :  { %v2039_v45 = vld [vmem:[#allocation5 + $0x1b4] sm:$0xf]  ;;  %v1681_v46 = vld [vmem:[#allocation5 + $0x1bc] sm:$0xf0]  ;;  %v1652_v48 = vor.u32 %v2032_v40, %v1651_v39  ;;  %v2018_v49 = vld [vmem:[#allocation5 + $0x10c] sm:$0xf] }
  0x37   :  { %556 = vmatpush.bf16.msra.mxu0 %v1476_v23  ;;  %v1597_v50 = vld [vmem:[#allocation5 + $0x114] sm:$0xf0]  ;;  %v2005_v52 = vld [vmem:[#allocation5 + $0xa0] sm:$0xf0]  ;;  %v2015_v55 = vld [vmem:[#allocation5 + $0xf4] sm:$0xf]  ;;  %v1684_v57 = vor.u32 %v2039_v45, %v1681_v46 }
  0x38   :  { %603 = vmatpush.bf16.msrb.mxu2 %v1636_v15  ;;  %569 = vmatpush.bf16.msra.mxu1 %v1572_v28  ;;  %v1543_v51 = vld [vmem:[#allocation5 + $0x98] sm:$0xf]  ;;  %v2029_v54 = vld [vmem:[#allocation5 + $0x160] sm:$0xf0]  ;;  %v1585_v56 = vld [vmem:[#allocation5 + $0xfc] sm:$0xf0]  ;;  %v1600_v58 = vor.u32 %v2018_v49, %v1597_v50 }
  0x39   :  { %595 = vmatpush.bf16.msra.mxu3 %v1480_v32  ;;  %v1639_v53 = vld [vmem:[#allocation5 + $0x158] sm:$0xf]  ;;  %v1531_v59 = vld [vmem:[#allocation5 + $0x80] sm:$0xf]  ;;  %v2036_v60 = vld [vmem:[#allocation5 + $0x19c] sm:$0xf]  ;;  %v1544_v0 = vor.u32 %v2005_v52, %v1543_v51  ;;  %v1588_v8 = vor.u32 %v2015_v55, %v1585_v56 }
  0x3a   :  { %v1669_v61 = vld [vmem:[#allocation5 + $0x1a4] sm:$0xf0]  ;;  %v1640_v1 = vor.u32 %v2029_v54, %v1639_v53  ;;  %v2002_v3 = vld [vmem:[#allocation5 + $0x88] sm:$0xf0]  ;;  %v1627_v4 = vld [vmem:[#allocation5 + $0x140] sm:$0xf] }
  0x3b   :  { %557 = vmatpush.bf16.msra.mxu0 %v1464_v38  ;;  %v2026_v5 = vld [vmem:[#allocation5 + $0x148] sm:$0xf0]  ;;  %v1672_v6 = vor.u32 %v2036_v60, %v1669_v61  ;;  %v200_v7 = vld [vmem:[#allocation5 + $0x1d0] sm:$0xf]  ;;  %v2033_v9 = vld [vmem:[#allocation5 + $0x184] sm:$0xf]  ;;  %v1532_v13 = vor.u32 %v2002_v3, %v1531_v59 }
  0x3c   :  { %604 = vmatpush.bf16.msrb.mxu2 %v1624_v33  ;;  %570 = vmatpush.bf16.msra.mxu1 %v1560_v41  ;;  %v2382_v62 = vld [vmem:[#allocation1] sm:$0xff]  ;;  %v2384_v63 = vld [vmem:[#allocation1 + $0x12] sm:$0xff]  ;;  %v2386_v2 = vld [vmem:[#allocation1 + $0x9] sm:$0xff]  ;;  %v419_v12 = vunpack.c.l.b16 %v200_v7  ;;  %v1628_v14 = vor.u32 %v2026_v5, %v1627_v4 }
  0x3d   :  { %596 = vmatpush.bf16.msra.mxu3 %v1468_v42  ;;  %1689 = vmatmul.msk.bf16.vlgmr.msra.gmra.mxu2 %vm537_vm1, %v2384_v63  ;;  %v1657_v11 = vld [vmem:[#allocation5 + $0x18c] sm:$0xf0]  ;;  %v2012_v15 = vld [vmem:[#allocation5 + $0xdc] sm:$0xf]  ;;  %v1573_v16 = vld [vmem:[#allocation5 + $0xe4] sm:$0xf0] }
  0x3e   :  { %558 = vmatmul.bf16.vlgmr.msra.gmra.mxu0 %v2382_v62  ;;  %v1519_v17 = vld [vmem:[#allocation5 + $0x68] sm:$0xf]  ;;  %v1999_v18 = vld [vmem:[#allocation5 + $0x70] sm:$0xf0]  ;;  %v479_v21 = vpack.c.b16 %v419_v12, %v419_v12  ;;  %v2009_v22 = vld [vmem:[#allocation5 + $0xc4] sm:$0xf]  ;;  %v1660_v23 = vor.u32 %v2033_v9, %v1657_v11  ;;  %v1576_v24 = vor.u32 %v2012_v15, %v1573_v16 }
  0x3f   :  { %619 = vmatpush.bf16.msrb.mxu0 %v545_v44  ;;  %571 = vmatmul.bf16.vlgmr.msra.gmra.mxu1 %v2386_v2  ;;  %v1615_v19 = vld [vmem:[#allocation5 + $0x128] sm:$0xf]  ;;  %v2023_v20 = vld [vmem:[#allocation5 + $0x130] sm:$0xf0]  ;;  %v1561_v25 = vld [vmem:[#allocation5 + $0xcc] sm:$0xf0]  ;;  %v1520_v28 = vor.u32 %v1999_v18, %v1519_v17 }
  0x40   :  { %605 = vmatpush.bf16.msrb.mxu2 %v1612_v43  ;;  %628 = vmatpush.bf16.msrb.mxu1 %v1556_v47  ;;  %v1507_v26 = vld [vmem:[#allocation5 + $0x50] sm:$0xf]  ;;  %v1996_v27 = vld [vmem:[#allocation5 + $0x58] sm:$0xf0]  ;;  %v1616_v29 = vor.u32 %v2023_v20, %v1615_v19  ;;  %v548_v30 = vsel %vm540_vm0, %v479_v21, 0  ;;  %v1564_v34 = vor.u32 %v2009_v22, %v1561_v25 }
  0x41   :  { %641 = vmatpush.bf16.msrb.mxu3 %v1652_v48  ;;  %v1687_v31 = vld [vmem:[#allocation5 + $0x1b8] sm:$0xf]  ;;  %v2041_v32 = vld [vmem:[#allocation5 + $0x1c0] sm:$0xf0]  ;;  %v1603_v33 = vld [vmem:[#allocation5 + $0x110] sm:$0xf]  ;;  %v1508_v36 = vor.u32 %v1996_v27, %v1507_v26 }
  0x42   :  { %597 = vmatmul.bf16.vlgmr.msra.gmra.mxu3 %v2382_v62  ;;  %v2020_v10 = vld [vmem:[#allocation5 + $0x118] sm:$0xf0]  ;;  %v1688_v35 = vor.u32 %v2041_v32, %v1687_v31  ;;  %v1495_v38 = vld [vmem:[#allocation5 + $0x38] sm:$0xf]  ;;  %v1675_v39 = vld [vmem:[#allocation5 + $0x1a0] sm:$0xf] }
  0x43   :  { %620 = vmatpush.bf16.msrb.mxu0 %v1684_v57  ;;  %v1604_v37 = vor.u32 %v2020_v10, %v1603_v33  ;;  %v2038_v40 = vld [vmem:[#allocation5 + $0x1a8] sm:$0xf0]  ;;  %v1993_v41 = vld [vmem:[#allocation5 + $0x40] sm:$0xf0]  ;;  %v1591_v42 = vld [vmem:[#allocation5 + $0xf8] sm:$0xf] }
  0x44   :  { %606 = vmatpush.bf16.msrb.mxu2 %v1600_v58  ;;  %629 = vmatpush.bf16.msrb.mxu1 %v1544_v0  ;;  %v2017_v43 = vld [vmem:[#allocation5 + $0x100] sm:$0xf0]  ;;  %v1676_v44 = vor.u32 %v2038_v40, %v1675_v39  ;;  %v1496_v45 = vor.u32 %v1993_v41, %v1495_v38  ;;  %v1483_v47 = vld [vmem:[#allocation5 + $0x20] sm:$0xf]  ;;  %v1663_v48 = vld [vmem:[#allocation5 + $0x188] sm:$0xf] }
  0x45   :  { %642 = vmatpush.bf16.msrb.mxu3 %v1640_v1  ;;  %v1592_v46 = vor.u32 %v2017_v43, %v1591_v42  ;;  %v2035_v49 = vld [vmem:[#allocation5 + $0x190] sm:$0xf0]  ;;  %v1990_v50 = vld [vmem:[#allocation5 + $0x28] sm:$0xf0]  ;;  %v1579_v51 = vld [vmem:[#allocation5 + $0xe0] sm:$0xf] }
  0x46   :  { %v2014_v52 = vld [vmem:[#allocation5 + $0xe8] sm:$0xf0]  ;;  %v1664_v53 = vor.u32 %v2035_v49, %v1663_v48  ;;  %v1484_v54 = vor.u32 %v1990_v50, %v1483_v47  ;;  %v1471_v56 = vld [vmem:[#allocation5 + $0x8] sm:$0xf]  ;;  %v1987_v57 = vld [vmem:[#allocation5 + $0x10] sm:$0xf0] }
  0x47   :  { %621 = vmatpush.bf16.msrb.mxu0 %v1672_v6  ;;  %v1580_v55 = vor.u32 %v2014_v52, %v1579_v51  ;;  %v1567_v58 = vld [vmem:[#allocation5 + $0xc8] sm:$0xf]  ;;  %v2011_v59 = vld [vmem:[#allocation5 + $0xd0] sm:$0xf0]  ;;  %v1472_v60 = vor.u32 %v1987_v57, %v1471_v56  ;;  %v2057_v12 = vld [vmem:[#allocation7 + $0x74] sm:$0xf0] }
  0x48   :  { %607 = vmatpush.bf16.msrb.mxu2 %v1588_v8  ;;  %630 = vmatpush.bf16.msrb.mxu1 %v1532_v13  ;;  %v1568_v61 = vor.u32 %v2011_v59, %v1567_v58  ;;  %v2406_v9 = vld [vmem:[%s2444_s2] sm:$0x7]  ;;  %v1814_v13 = vld [vmem:[#allocation7 + $0xf0] sm:$0xf]  ;;  %v1742_v16 = vld [vmem:[#allocation7 + $0x60] sm:$0xf] }
  0x49   :  { %643 = vmatpush.bf16.msrb.mxu3 %v1628_v14  ;;  %v204_v11 = vperm.slane %v2406_v9, 1  ;;  %v2073_v15 = vld [vmem:[#allocation7 + $0xf4] sm:$0xf0]  ;;  %v2055_v17 = vld [vmem:[#allocation7 + $0x64] sm:$0xf0] }
  0x4a   :  { %v1815_v18 = vor.u32 %v2073_v15, %v1814_v13  ;;  %v1806_v19 = vld [vmem:[#allocation7 + $0xe0] sm:$0xf]  ;;  %v2071_v20 = vld [vmem:[#allocation7 + $0xe4] sm:$0xf0]  ;;  %v1734_v26 = vld [vmem:[#allocation7 + $0x50] sm:$0xf] }
  0x4b   :  { %622 = vmatpush.bf16.msrb.mxu0 %v1660_v23  ;;  %v1743_v23 = vor.u32 %v2055_v17, %v1742_v16  ;;  %v1807_v25 = vor.u32 %v2071_v20, %v1806_v19  ;;  %v2053_v27 = vld [vmem:[#allocation7 + $0x54] sm:$0xf0]  ;;  %v1878_v31 = vld [vmem:[#allocation7 + $0x170] sm:$0xf]  ;;  %v2056_v10 = vld [vmem:[#allocation7 + $0x74] sm:$0xf] }
  0x4c   :  { %608 = vmatpush.bf16.msrb.mxu2 %v1576_v24  ;;  %631 = vmatpush.bf16.msrb.mxu1 %v1520_v28  ;;  %v1798_v28 = vld [vmem:[#allocation7 + $0xd0] sm:$0xf]  ;;  %v2089_v32 = vld [vmem:[#allocation7 + $0x174] sm:$0xf0]  ;;  %v1726_v38 = vld [vmem:[#allocation7 + $0x40] sm:$0xf] }
  0x4d   :  { %644 = vmatpush.bf16.msrb.mxu3 %v1616_v29  ;;  %v1879_v33 = vor.u32 %v2089_v32, %v1878_v31  ;;  %v2051_v39 = vld [vmem:[#allocation7 + $0x44] sm:$0xf0]  ;;  %v1870_v42 = vld [vmem:[#allocation7 + $0x160] sm:$0xf]  ;;  %v1744_v49 = vld [vmem:[#allocation7 + $0x68] sm:$0xf0] }
  0x4e   :  { %1690 = vmatmul.msk.bf16.vlgmr.msrb.gmra.mxu0 %vm537_vm1, %v2384_v63  ;;  %v2087_v43 = vld [vmem:[#allocation7 + $0x164] sm:$0xf0]  ;;  %v1718_v57 = vld [vmem:[#allocation7 + $0x30] sm:$0xf]  ;;  %v2049_v58 = vld [vmem:[#allocation7 + $0x34] sm:$0xf0] }
  0x4f   :  { %658 = vmatpush.bf16.msra.mxu0 %v548_v30  ;;  %v2069_v30 = vld [vmem:[#allocation7 + $0xd4] sm:$0xf0]  ;;  %v2067_v47 = vld [vmem:[#allocation7 + $0xc4] sm:$0xf0]  ;;  %v1871_v48 = vor.u32 %v2087_v43, %v1870_v42  ;;  %v1710_v16 = vld [vmem:[#allocation7 + $0x20] sm:$0xf] }
  0x50   :  { %609 = vmatpush.bf16.msrb.mxu2 %v1564_v34  ;;  %632 = vmatpush.bf16.msrb.mxu1 %v1508_v36  ;;  %v1752_v34 = vld [vmem:[#allocation7 + $0x78] sm:$0xf0]  ;;  %v205_v36 = vperm.slane %v2406_v9, 2  ;;  %v1799_v41 = vor.u32 %v2069_v30, %v1798_v28  ;;  %v2047_v17 = vld [vmem:[#allocation7 + $0x24] sm:$0xf0] }
  0x51   :  { %645 = vmatpush.bf16.msrb.mxu3 %v1604_v37  ;;  %v1735_v37 = vor.u32 %v2053_v27, %v1734_v26  ;;  %v1755_v40 = vor.u32 %v2056_v10, %v1752_v34  ;;  %v1711_v19 = vor.u32 %v2047_v17, %v1710_v16  ;;  %v2063_v20 = vld [vmem:[#allocation7 + $0xa4] sm:$0xf0]  ;;  %v1736_v26 = vld [vmem:[#allocation7 + $0x58] sm:$0xf0]  ;;  %v1702_v28 = vld [vmem:[#allocation7 + $0x10] sm:$0xf] }
  0x52   :  { %v1766_v30 = vld [vmem:[#allocation7 + $0x90] sm:$0xf]  ;;  %v2061_v32 = vld [vmem:[#allocation7 + $0x94] sm:$0xf0]  ;;  %v2083_v10 = vld [vmem:[#allocation7 + $0x144] sm:$0xf0] }
  0x53   :  { %659 = vmatpush.bf16.msra.mxu0 %v1688_v35  ;;  %610 = vmatmul.bf16.vlgmr.msrb.gmra.mxu2 %v2386_v2  ;;  %v1767_v34 = vor.u32 %v2061_v32, %v1766_v30  ;;  %v2059_v43 = vld [vmem:[#allocation7 + $0x84] sm:$0xf0]  ;;  %v2082_v30 = vld [vmem:[#allocation7 + $0x144] sm:$0xf] }
  0x54   :  { %633 = vmatpush.bf16.msrb.mxu1 %v1496_v45 }
  0x55   :  { %646 = vmatpush.bf16.msrb.mxu3 %v1592_v46  ;;  %v1790_v46 = vld [vmem:[#allocation7 + $0xc0] sm:$0xf] }
  0x56   :  { %v1791_v56 = vor.u32 %v2067_v47, %v1790_v46 }
  0x57   :  { %660 = vmatpush.bf16.msra.mxu0 %v1676_v44  ;;  %v2054_v44 = vld [vmem:[#allocation7 + $0x64] sm:$0xf] }
  0x58   :  { %634 = vmatpush.bf16.msrb.mxu1 %v1484_v54  ;;  %v1747_v51 = vor.u32 %v2054_v44, %v1744_v49  ;;  %v1727_v54 = vor.u32 %v2051_v39, %v1726_v38  ;;  %v1694_v39 = vld [vmem:[#allocation7] sm:$0xf]  ;;  %v1846_v44 = vld [vmem:[#allocation7 + $0x130] sm:$0xf]  ;;  %v1720_v49 = vld [vmem:[#allocation7 + $0x38] sm:$0xf0] }
  0x59   :  { %647 = vmatpush.bf16.msrb.mxu3 %v1580_v55 }
  0x5b   :  { %661 = vmatpush.bf16.msra.mxu0 %v1664_v53 }
  0x5c   :  { %635 = vmatpush.bf16.msrb.mxu1 %v1472_v60 }
  0x5d   :  { %648 = vmatpush.bf16.msrb.mxu3 %v1568_v61  ;;  %v1782_v61 = vld [vmem:[#allocation7 + $0xb0] sm:$0xf] }
  0x5e   :  { %1691 = vmatmul.msk.bf16.vlgmr.msra.gmra.mxu0 %vm537_vm1, %v2384_v63  ;;  %v1750_v63 = vld [vmem:[#allocation7 + $0x70] sm:$0xf] }
  0x5f   :  { %636 = vmatmul.bf16.vlgmr.msrb.gmra.mxu1 %v2382_v62  ;;  %v1751_v14 = vor.u32 %v2057_v12, %v1750_v63  ;;  %1001 = vmatpush.bf16.msrb.mxu0 %v1815_v18  ;;  %v1774_v18 = vld [vmem:[#allocation7 + $0xa0] sm:$0xf] }
  0x60   :  { %649 = vmatmul.bf16.vlgmr.msrb.gmra.mxu3 %v2386_v2  ;;  %v203_v2 = vperm.slane %v2406_v9, 0  ;;  %1014 = vmatpush.bf16.msra.mxu1 %v1879_v33  ;;  %v1854_v33 = vld [vmem:[#allocation7 + $0x140] sm:$0xf] }
  0x61   :  { %988 = vmatpush.bf16.msra.mxu2 %v1751_v14  ;;  %1027 = vmatpush.bf16.msra.mxu3 %v1755_v40  ;;  %v2043_v40 = vld [vmem:[#allocation7 + $0x4] sm:$0xf0] }
  0x62   :  { %v1695_v42 = vor.u32 %v2043_v40, %v1694_v39  ;;  %v1776_v39 = vld [vmem:[#allocation7 + $0xa8] sm:$0xf0]  ;;  %v2078_v40 = vld [vmem:[#allocation7 + $0x124] sm:$0xf] }
  0x63   :  { %1002 = vmatpush.bf16.msrb.mxu0 %v1807_v25  ;;  %v2052_v25 = vld [vmem:[#allocation7 + $0x54] sm:$0xf] }
  0x64   :  { %1015 = vmatpush.bf16.msra.mxu1 %v1871_v48  ;;  %v1739_v27 = vor.u32 %v2052_v25, %v1736_v26  ;;  %v2048_v48 = vld [vmem:[#allocation7 + $0x34] sm:$0xf]  ;;  %v1696_v25 = vld [vmem:[#allocation7 + $0x8] sm:$0xf0]  ;;  %v2066_v26 = vld [vmem:[#allocation7 + $0xc4] sm:$0xf] }
  0x65   :  { %989 = vmatpush.bf16.msra.mxu2 %v1743_v23  ;;  %1028 = vmatpush.bf16.msra.mxu3 %v1747_v51  ;;  %v1775_v23 = vor.u32 %v2063_v20, %v1774_v18  ;;  %v1723_v51 = vor.u32 %v2048_v48, %v1720_v49  ;;  %v2084_v18 = vld [vmem:[#allocation7 + $0x154] sm:$0xf] }
  0x67   :  { %1003 = vmatpush.bf16.msrb.mxu0 %v1799_v41  ;;  %v1758_v41 = vld [vmem:[#allocation7 + $0x80] sm:$0xf] }
  0x68   :  { %v1759_v46 = vor.u32 %v2059_v43, %v1758_v41  ;;  %v1840_v41 = vld [vmem:[#allocation7 + $0x128] sm:$0xf0] }
  0x69   :  { %990 = vmatpush.bf16.msra.mxu2 %v1735_v37  ;;  %1029 = vmatpush.bf16.msra.mxu3 %v1739_v27  ;;  %v1728_v37 = vld [vmem:[#allocation7 + $0x48] sm:$0xf0]  ;;  %v1843_v43 = vor.u32 %v2078_v40, %v1840_v41 }
  0x6a   :  { %v1792_v27 = vld [vmem:[#allocation7 + $0xc8] sm:$0xf0] }
  0x6b   :  { %1004 = vmatpush.bf16.msrb.mxu0 %v1791_v56 }
  0x6d   :  { %991 = vmatpush.bf16.msra.mxu2 %v1727_v54  ;;  %v1880_v54 = vld [vmem:[#allocation7 + $0x178] sm:$0xf0] }
  0xbb   :  { %v559_v0 = vpop.f32.mrf.mxu0 }
  0xbc   :  { %v572_v1 = vpop.f32.mrf.mxu1  ;;  %v560_v29 = vadd.f32 %v559_v0, %v203_v2  ;;  %v2065_v0 = vld [vmem:[#allocation7 + $0xb4] sm:$0xf0] }
  0xbe   :  { %v573_v45 = vadd.f32 %v572_v1, %v560_v29  ;;  %v1719_v1 = vor.u32 %v2049_v58, %v1718_v57  ;;  %v2045_v29 = vld [vmem:[#allocation7 + $0x14] sm:$0xf0]  ;;  %v1838_v57 = vld [vmem:[#allocation7 + $0x120] sm:$0xf]  ;;  %v2079_v58 = vld [vmem:[#allocation7 + $0x124] sm:$0xf0] }
  0xbf   :  { %v1703_v31 = vor.u32 %v2045_v29, %v1702_v28  ;;  %v1795_v29 = vor.u32 %v2066_v26, %v1792_v27  ;;  %v2090_v26 = vld [vmem:[#allocation8] sm:$0xff] }
  0xc0   :  { %v2401_v3 = vpop.f32.mrf.mxu2  ;;  %992 = vmatpush.bf16.msra.mxu2 %v1719_v1  ;;  %v1808_v1 = vld [vmem:[#allocation7 + $0xe8] sm:$0xf0] }
  0xc1   :  { %v586_v59 = vadd.f32 %v2401_v3, %v573_v45  ;;  %v2081_v45 = vld [vmem:[#allocation7 + $0x134] sm:$0xf0] }
  0xc2   :  { %v1847_v47 = vor.u32 %v2081_v45, %v1846_v44  ;;  %v2060_v44 = vld [vmem:[#allocation7 + $0x94] sm:$0xf]  ;;  %v1768_v45 = vld [vmem:[#allocation7 + $0x98] sm:$0xf0] }
  0xc3   :  { %v561_v5 = vpop.f32.mrf.mxu0  ;;  %v1771_v49 = vor.u32 %v2060_v44, %v1768_v45 }
  0xc4   :  { %v574_v6 = vpop.f32.mrf.mxu1  ;;  %v1783_v5 = vor.u32 %v2065_v0, %v1782_v61  ;;  %993 = vmatpush.bf16.msra.mxu2 %v1711_v19  ;;  %v1712_v61 = vld [vmem:[#allocation7 + $0x28] sm:$0xf0]  ;;  %v2070_v0 = vld [vmem:[#allocation7 + $0xe4] sm:$0xf]  ;;  %v1864_v19 = vld [vmem:[#allocation7 + $0x158] sm:$0xf0] }
  0xc5   :  { %v598_v4 = vpop.f32.mrf.mxu3  ;;  %v1867_v20 = vor.u32 %v2084_v18, %v1864_v19  ;;  %v2103_v19 = vld [vmem:[#allocation8 + $0x68] sm:$0xff] }
  0xc6   :  { %v599_v21 = vadd.f32 %v598_v4, %v204_v11  ;;  %1005 = vmatpush.bf16.msrb.mxu0 %v1783_v5  ;;  %v1811_v5 = vor.u32 %v2070_v0, %v1808_v1 }
  0xc8   :  { %v587_v7 = vpop.f32.mrf.mxu2  ;;  %994 = vmatpush.bf16.msra.mxu2 %v1703_v31  ;;  %v1856_v31 = vld [vmem:[#allocation7 + $0x148] sm:$0xf0] }
  0xc9   :  { %v1859_v32 = vor.u32 %v2082_v30, %v1856_v31  ;;  %v2101_v30 = vld [vmem:[#allocation8 + $0x58] sm:$0xff] }
  0xca   :  { %1006 = vmatpush.bf16.msrb.mxu0 %v1775_v23  ;;  %v2042_v23 = vld [vmem:[#allocation7 + $0x4] sm:$0xf] }
  0xcb   :  { %v624_v62 = vpop.f32.mrf.mxu0  ;;  %v1699_v28 = vor.u32 %v2042_v23, %v1696_v25 }
  0xcc   :  { %995 = vmatpush.bf16.msra.mxu2 %v1695_v42 }
  0xcd   :  { %v600_v8 = vpop.f32.mrf.mxu3 }
  0xce   :  { %1007 = vmatpush.bf16.msrb.mxu0 %v1767_v34  ;;  %v2080_v34 = vld [vmem:[#allocation7 + $0x134] sm:$0xf] }
  0xd2   :  { %1008 = vmatpush.bf16.msrb.mxu0 %v1759_v46  ;;  %v2076_v46 = vld [vmem:[#allocation7 + $0x114] sm:$0xf] }
  0xd3   :  { %v626_v24 = vpop.f32.mrf.mxu0 }
  0xd6   :  { %v611_v22 = vpop.f32.mrf.mxu2 }
  0xd7   :  { %v612_v35 = vadd.f32 %v611_v22, %v599_v21  ;;  %v1862_v21 = vld [vmem:[#allocation7 + $0x150] sm:$0xf]  ;;  %v2085_v22 = vld [vmem:[#allocation7 + $0x154] sm:$0xf0] }
  0xd8   :  { %v1863_v24 = vor.u32 %v2085_v22, %v1862_v21  ;;  %v1822_v21 = vld [vmem:[#allocation7 + $0x100] sm:$0xf]  ;;  %v2075_v22 = vld [vmem:[#allocation7 + $0x104] sm:$0xf0] }
  0xd9   :  { %v625_v52 = vadd.f32 %v624_v62, %v612_v35  ;;  %v1855_v35 = vor.u32 %v2083_v10, %v1854_v33  ;;  %v2064_v33 = vld [vmem:[#allocation7 + $0xb4] sm:$0xf]  ;;  %v1784_v10 = vld [vmem:[#allocation7 + $0xb8] sm:$0xf0] }
  0xda   :  { %1016 = vmatpush.bf16.msra.mxu1 %v1863_v24  ;;  %v1823_v24 = vor.u32 %v2075_v22, %v1822_v21  ;;  %v2091_v21 = vld [vmem:[#allocation8 + $0x8] sm:$0xff]  ;;  %v2102_v22 = vld [vmem:[#allocation8 + $0x60] sm:$0xff] }
  0xdb   :  { %v663_v55 = vpop.f32.mrf.mxu0  ;;  %2131 = vtanh.f32 %v625_v52  ;;  %v1816_v52 = vld [vmem:[#allocation7 + $0xf8] sm:$0xf0] }
  0xdc   :  { %v637_v50 = vpop.f32.mrf.mxu1  ;;  %2133 = vtanh.f32 %v586_v59  ;;  %v2046_v59 = vld [vmem:[#allocation7 + $0x24] sm:$0xf] }
  0xdd   :  { %v638_v60 = vadd.f32 %v637_v50, %v205_v36  ;;  %v2050_v36 = vld [vmem:[#allocation7 + $0x44] sm:$0xf]  ;;  %v2072_v50 = vld [vmem:[#allocation7 + $0xf4] sm:$0xf] }
  0xde   :  { %v613_v53 = vpop.f32.mrf.mxu2  ;;  %v1731_v38 = vor.u32 %v2050_v36, %v1728_v37  ;;  %1017 = vmatpush.bf16.msra.mxu1 %v1855_v35  ;;  %v1787_v35 = vor.u32 %v2064_v33, %v1784_v10  ;;  %v1848_v36 = vld [vmem:[#allocation7 + $0x138] sm:$0xf0]  ;;  %v2100_v33 = vld [vmem:[#allocation8 + $0x50] sm:$0xff] }
  0xdf   :  { %v2088_v53 = vld [vmem:[#allocation7 + $0x174] sm:$0xf]  ;;  %v1851_v37 = vor.u32 %v2080_v34, %v1848_v36 }
  0xe0   :  { %1030 = vmatpush.bf16.msra.mxu3 %v1731_v38  ;;  %v1883_v56 = vor.u32 %v2088_v53, %v1880_v54  ;;  %v2062_v38 = vld [vmem:[#allocation7 + $0xa4] sm:$0xf] }
  0xe1   :  { %v2412_v62 = vpop.eup %2131  ;;  %v1779_v42 = vor.u32 %v2062_v38, %v1776_v39  ;;  %v2074_v54 = vld [vmem:[#allocation7 + $0x104] sm:$0xf] }
  0xe2   :  { %v2414_v3 = vpop.eup %2133  ;;  %v671_v11 = vmul.f32 %v2412_v62, %v2412_v62  ;;  %1018 = vmatpush.bf16.msra.mxu1 %v1847_v47  ;;  %1053 = vmatpush.bf16.msra.mxu0 %v1883_v56  ;;  %v1832_v47 = vld [vmem:[#allocation7 + $0x118] sm:$0xf0]  ;;  %v2098_v38 = vld [vmem:[#allocation8 + $0x40] sm:$0xff] }
  0xe3   :  { %v650_v4 = vpop.f32.mrf.mxu3  ;;  %v665_v9 = vpop.f32.mrf.mxu0  ;;  %v670_v63 = vmul.f32 %v2414_v3, %v2414_v3 }
  0xe4   :  { %v651_v6 = vadd.f32 %v650_v4, %v638_v60  ;;  %v639_v7 = vpop.f32.mrf.mxu1  ;;  %1031 = vmatpush.bf16.msra.mxu3 %v1723_v51  ;;  %v1839_v60 = vor.u32 %v2079_v58, %v1838_v57  ;;  %v1715_v4 = vor.u32 %v2046_v59, %v1712_v61  ;;  %v1830_v9 = vld [vmem:[#allocation7 + $0x110] sm:$0xf]  ;;  %v2058_v51 = vld [vmem:[#allocation7 + $0x84] sm:$0xf] }
  0xe5   :  { %v673_v14 = vadd.f32 %v671_v11, %v670_v63  ;;  %v1872_v7 = vld [vmem:[#allocation7 + $0x168] sm:$0xf0]  ;;  %v2044_v11 = vld [vmem:[#allocation7 + $0x14] sm:$0xf] }
  0xe6   :  { %v664_v8 = vadd.f32 %v663_v55, %v651_v6  ;;  %v1819_v55 = vor.u32 %v2072_v50, %v1816_v52  ;;  %v2086_v6 = vld [vmem:[#allocation7 + $0x164] sm:$0xf]  ;;  %1019 = vmatpush.bf16.msra.mxu1 %v1839_v60  ;;  %v1835_v50 = vor.u32 %v2076_v46, %v1832_v47  ;;  %v1760_v52 = vld [vmem:[#allocation7 + $0x88] sm:$0xf0] }
  0xe7   :  { %v1763_v56 = vor.u32 %v2058_v51, %v1760_v52 }
  0xe8   :  { %2135 = vtanh.f32 %v664_v8  ;;  %1040 = vmatpush.bf16.msrb.mxu2 %v1819_v55  ;;  %v1875_v8 = vor.u32 %v2086_v6, %v1872_v7  ;;  %1032 = vmatpush.bf16.msra.mxu3 %v1715_v4  ;;  %v1824_v55 = vld [vmem:[#allocation7 + $0x108] sm:$0xf0] }
  0xe9   :  { %v1827_v57 = vor.u32 %v2074_v54, %v1824_v55 }
  0xea   :  { %1054 = vmatpush.bf16.msra.mxu0 %v1875_v8 }
  0xeb   :  { %v652_v2 = vpop.f32.mrf.mxu3 }
  0xec   :  { %v2077_v2 = vld [vmem:[#allocation7 + $0x114] sm:$0xf0]  ;;  %1041 = vmatpush.bf16.msrb.mxu2 %v1811_v5 }
  0xed   :  { %v1831_v63 = vor.u32 %v2077_v2, %v1830_v9 }
  0xee   :  { %v2420_v12 = vpop.eup %2135  ;;  %1055 = vmatpush.bf16.msra.mxu0 %v1867_v20 }
  0xef   :  { %v672_v13 = vmul.f32 %v2420_v12, %v2420_v12  ;;  %1020 = vmatpush.bf16.msra.mxu1 %v1831_v63  ;;  %v2096_v63 = vld [vmem:[#allocation8 + $0x30] sm:$0xff] }
  0xf1   :  { %v674_v15 = vadd.f32 %v673_v14, %v672_v13  ;;  %v1704_v13 = vld [vmem:[#allocation7 + $0x18] sm:$0xf0]  ;;  %v2068_v14 = vld [vmem:[#allocation7 + $0xd4] sm:$0xf] }
  0xf2   :  { %v1707_v16 = vor.u32 %v2044_v11, %v1704_v13  ;;  %1056 = vmatpush.bf16.msra.mxu0 %v1859_v32  ;;  %v2097_v11 = vld [vmem:[#allocation8 + $0x38] sm:$0xff]  ;;  %v2095_v13 = vld [vmem:[#allocation8 + $0x28] sm:$0xff] }
  0xf3   :  { %675 = vadd.xlane.f32.xlu0 %v674_v15  ;;  %v1800_v15 = vld [vmem:[#allocation7 + $0xd8] sm:$0xf0]  ;;  %1021 = vmatpush.bf16.msra.mxu1 %v1823_v24 }
  0xf4   :  { %v1803_v17 = vor.u32 %v2068_v14, %v1800_v15  ;;  %1033 = vmatpush.bf16.msra.mxu3 %v1707_v16  ;;  %v2104_v14 = vld [vmem:[#allocation8 + $0x70] sm:$0xff] }
  0xf5   :  { %v2092_v15 = vld [vmem:[#allocation8 + $0x10] sm:$0xff] }
  0xf6   :  { %1042 = vmatpush.bf16.msrb.mxu2 %v1803_v17  ;;  %1057 = vmatpush.bf16.msra.mxu0 %v1851_v37  ;;  %v742_v17 = vld [vmem:[%s2446_s4] sm:$0x3] }
  0xf7   :  { %1238 = vmatpush.bf16.msrb.mxu1 %v2097_v11  ;;  %v744_v20 = vperm.slane %v742_v17, 0  ;;  %v745_v37 = vperm.slane %v742_v17, 1  ;;  %v2107_v17 = vld [vmem:[#allocation10 + $0x8] sm:$0xff] }
  0xf8   :  { %1034 = vmatpush.bf16.msra.mxu3 %v1699_v28 }
  0xfa   :  { %1043 = vmatpush.bf16.msrb.mxu2 %v1795_v29  ;;  %1058 = vmatpush.bf16.msra.mxu0 %v1843_v43 }
  0xfb   :  { %1239 = vmatpush.bf16.msrb.mxu1 %v2096_v63  ;;  %v2113_v63 = vld [vmem:[#allocation10 + $0x38] sm:$0xff] }
  0xfe   :  { %1044 = vmatpush.bf16.msrb.mxu2 %v1787_v35  ;;  %1059 = vmatpush.bf16.msra.mxu0 %v1835_v50  ;;  %v2099_v35 = vld [vmem:[#allocation8 + $0x48] sm:$0xff] }
  0xff   :  { %1240 = vmatpush.bf16.msrb.mxu1 %v2095_v13  ;;  %v2112_v13 = vld [vmem:[#allocation10 + $0x30] sm:$0xff] }
 0x102   :  { %1045 = vmatpush.bf16.msrb.mxu2 %v1779_v42  ;;  %1060 = vmatpush.bf16.msra.mxu0 %v1827_v57 }
 0x106   :  { %1046 = vmatpush.bf16.msrb.mxu2 %v1771_v49 }
 0x10a   :  { %1047 = vmatpush.bf16.msrb.mxu2 %v1763_v56 }
 0x166   :  { %v676_v48 = vpop.xlane.xlu0 %675 }
 0x167   :  { %v677_v53 = vmax.f32 %v676_v48, 1e-24 }
 0x169   :  { %2137 = vrsqrt.f32 %v677_v53  ;;  %vm684_vm3 = vweird.f32 %v677_v53 }
 0x16f   :  { %v2138_v58 = vpop.eup %2137 }
 0x170   :  { %v679_v59 = vmul.f32 %v2138_v58, %v677_v53  ;;  %vm685_vm2 = vweird.f32 %v2138_v58 }
 0x171   :  { %vm686_vm4 = vmor %vm684_vm3, %vm685_vm2 }
 0x172   :  { %v680_v60 = vmul.f32 %v2138_v58, %v679_v59 }
 0x174   :  { %v681_v61 = vmul.f32 0.5, %v680_v60 }
 0x176   :  { %v682_v0 = vsub.f32 1.5, %v681_v61 }
 0x178   :  { %v683_v1 = vmul.f32 %v2138_v58, %v682_v0 }
 0x17a   :  { %v687_v4 = vsel %vm686_vm4, %v2138_v58, %v683_v1 }
 0x17b   :  { %v688_v5 = vmul.f32 %v2414_v3, %v687_v4  ;;  %v689_v6 = vmul.f32 %v2412_v62, %v687_v4  ;;  %v690_v7 = vmul.f32 %v2420_v12, %v687_v4  ;;  %v2094_v3 = vld [vmem:[#allocation8 + $0x20] sm:$0xff]  ;;  %v2105_v62 = vld [vmem:[#allocation8 + $0x78] sm:$0xff] }
 0x17c   :  { %1241 = vmatpush.bf16.msrb.mxu1 %v2094_v3  ;;  %1251 = vmatpush.bf16.msrb.mxu3 %v2105_v62  ;;  %v2093_v12 = vld [vmem:[#allocation8 + $0x18] sm:$0xff]  ;;  %v2111_v3 = vld [vmem:[#allocation10 + $0x28] sm:$0xff] }
 0x17d   :  { %v691_v8 = vpack.c.bf16 %v688_v5, %v688_v5  ;;  %v692_v9 = vpack.c.bf16 %v689_v6, %v689_v6  ;;  %v693_v2 = vpack.c.bf16 %v690_v7, %v690_v7 }
 0x17f   :  { %996 = vmatmul.bf16.vlgmr.msra.gmra.mxu2 %v691_v8  ;;  %1009 = vmatmul.bf16.vlgmr.msrb.gmra.mxu0 %v692_v9 }
 0x180   :  { %1022 = vmatmul.bf16.vlgmr.msra.gmra.mxu1 %v693_v2  ;;  %1035 = vmatmul.bf16.vlgmr.msra.gmra.mxu3 %v691_v8 }
 0x181   :  { %1242 = vmatpush.bf16.msrb.mxu1 %v2093_v12  ;;  %1252 = vmatpush.bf16.msrb.mxu3 %v2104_v14  ;;  %v2110_v12 = vld [vmem:[#allocation10 + $0x20] sm:$0xff]  ;;  %v2109_v14 = vld [vmem:[#allocation10 + $0x18] sm:$0xff] }
 0x182   :  { %1352 = vmatpush.bf16.msra.mxu2 %v2113_v63 }
 0x185   :  { %1243 = vmatpush.bf16.msrb.mxu1 %v2092_v15  ;;  %1253 = vmatpush.bf16.msrb.mxu3 %v2103_v19  ;;  %v2106_v19 = vld [vmem:[#allocation10] sm:$0xff] }
 0x186   :  { %1353 = vmatpush.bf16.msra.mxu2 %v2112_v13 }
 0x189   :  { %1244 = vmatpush.bf16.msrb.mxu1 %v2091_v21  ;;  %1254 = vmatpush.bf16.msrb.mxu3 %v2102_v22 }
 0x18a   :  { %1354 = vmatpush.bf16.msra.mxu2 %v2111_v3 }
 0x18d   :  { %1245 = vmatpush.bf16.msrb.mxu1 %v2090_v26  ;;  %1255 = vmatpush.bf16.msrb.mxu3 %v2101_v30 }
 0x18e   :  { %1355 = vmatpush.bf16.msra.mxu2 %v2110_v12 }
 0x18f   :  { %1048 = vmatmul.bf16.vlgmr.msrb.gmra.mxu2 %v692_v9  ;;  %1061 = vmatmul.bf16.vlgmr.msra.gmra.mxu0 %v693_v2 }
 0x191   :  { %1256 = vmatpush.bf16.msrb.mxu3 %v2100_v33 }
 0x192   :  { %1356 = vmatpush.bf16.msra.mxu2 %v2109_v14 }
 0x195   :  { %1257 = vmatpush.bf16.msrb.mxu3 %v2099_v35 }
 0x199   :  { %1258 = vmatpush.bf16.msrb.mxu3 %v2098_v38 }
 0x1fc   :  { %v1010_v16 = vpop.f32.mrf.mxu0 }
 0x1fd   :  { %v1023_v18 = vpop.f32.mrf.mxu1 }
 0x202   :  { %v997_v23 = vpop.f32.mrf.mxu2 }
 0x203   :  { %v998_v24 = vadd.f32 %v997_v23, %v744_v20  ;;  %v1036_v25 = vpop.f32.mrf.mxu3 }
 0x204   :  { %v1012_v27 = vpop.f32.mrf.mxu0  ;;  %v1037_v40 = vadd.f32 %v1036_v25, %v745_v37  ;;  %v2128_v37 = vld [vmem:[%s2450_s8] ss:$0 sm:$0xff] }
 0x205   :  { %v1011_v28 = vadd.f32 %v1010_v16, %v998_v24  ;;  %v1025_v29 = vpop.f32.mrf.mxu1  ;;  %v2108_v16 = vld [vmem:[#allocation10 + $0x10] sm:$0xff] }
 0x206   :  { %1357 = vmatpush.bf16.msra.mxu2 %v2108_v16 }
 0x207   :  { %v1024_v31 = vadd.f32 %v1023_v18, %v1011_v28  ;;  %v2127_v18 = vld [vmem:[%s2448_s6] ss:$0 sm:$0xff] }
 0x209   :  { %v1884_v32 = vmul.f32 -1.442695, %v1024_v31 }
 0x20a   :  { %v999_v10 = vpop.f32.mrf.mxu2  ;;  %1358 = vmatpush.bf16.msra.mxu2 %v2107_v17 }
 0x20b   :  { %2139 = vpow2.f32 %v1884_v32  ;;  %v1038_v34 = vpop.f32.mrf.mxu3 }
 0x20c   :  { %v1062_v36 = vpop.f32.mrf.mxu0 }
 0x20e   :  { %1359 = vmatpush.bf16.msra.mxu2 %v2106_v19 }
 0x211   :  { %v2140_v39 = vpop.eup %2139 }
 0x212   :  { %v1072_v41 = vadd.f32 1.0, %v2140_v39  ;;  %v1049_v42 = vpop.f32.mrf.mxu2 }
 0x213   :  { %v1050_v43 = vadd.f32 %v1049_v42, %v1037_v40 }
 0x214   :  { %2141 = vrcp.f32 %v1072_v41  ;;  %v1064_v44 = vpop.f32.mrf.mxu0  ;;  %v1085_v51 = vand.u32 2147483648, %v1072_v41  ;;  %v1083_v54 = vand.u32 2147483647, %v1072_v41  ;;  %vm1079_vm6 = vweird.f32 %v1072_v41 }
 0x215   :  { %v1063_v45 = vadd.f32 %v1062_v36, %v1050_v43 }
 0x216   :  { %v1086_v57 = vor.u32 1.1754944e-38, %v1085_v51  ;;  %vm1084_vm8 = vcmp.eq.f32.partialorder %v1083_v54, 8.507059e+37  ;;  %v2129_v51 = vld [vmem:[%s2451_s9] ss:$0 sm:$0xff] }
 0x217   :  { %v1885_v46 = vmul.f32 -1.442695, %v1063_v45 }
 0x219   :  { %2143 = vpow2.f32 %v1885_v46 }
 0x21a   :  { %v2142_v47 = vpop.eup %2141  ;;  %v1051_v48 = vpop.f32.mrf.mxu2 }
 0x21b   :  { %v1075_v49 = vmul.f32 %v2142_v47, %v1072_v41  ;;  %vm1080_vm5 = vweird.f32 %v2142_v47 }
 0x21c   :  { %vm1081_vm7 = vmor %vm1079_vm6, %vm1080_vm5 }
 0x21d   :  { %v1076_v50 = vsub.f32 1.0, %v1075_v49 }
 0x21f   :  { %v2144_v52 = vpop.eup %2143  ;;  %v1077_v53 = vmul.f32 %v2142_v47, %v1076_v50 }
 0x220   :  { %v1073_v55 = vadd.f32 1.0, %v2144_v52 }
 0x221   :  { %v1078_v56 = vadd.f32 %v2142_v47, %v1077_v53 }
 0x222   :  { %2145 = vrcp.f32 %v1073_v55  ;;  %v1100_v4 = vand.u32 2147483648, %v1073_v55  ;;  %v1098_v6 = vand.u32 2147483647, %v1073_v55  ;;  %vm1094_vm10 = vweird.f32 %v1073_v55 }
 0x223   :  { %v1082_v58 = vsel %vm1081_vm7, %v2142_v47, %v1078_v56  ;;  %v2130_v56 = vld [vmem:[#allocation2] ss:$0 sm:$0xff]  ;;  %vm1415_vm7 = vcmask 7168  }
 0x224   :  { %v1087_v59 = vsel %vm1084_vm8, %v1086_v57, %v1082_v58  ;;  %v1101_v8 = vor.u32 1.1754944e-38, %v1100_v4  ;;  %vm1099_vm12 = vcmp.eq.f32.partialorder %v1098_v6, 8.507059e+37 }
 0x225   :  { %v1104_v60 = vpack.c.bf16 %v1087_v59, %v1087_v59 }
 0x227   :  { %1246 = vmatmul.bf16.vlgmr.msrb.gmra.mxu1 %v1104_v60 }
 0x228   :  { %v2146_v61 = vpop.eup %2145 }
 0x229   :  { %v1090_v0 = vmul.f32 %v2146_v61, %v1073_v55  ;;  %vm1095_vm9 = vweird.f32 %v2146_v61 }
 0x22a   :  { %vm1096_vm11 = vmor %vm1094_vm10, %vm1095_vm9 }
 0x22b   :  { %v1091_v1 = vsub.f32 1.0, %v1090_v0 }
 0x22d   :  { %v1092_v5 = vmul.f32 %v2146_v61, %v1091_v1 }
 0x22f   :  { %v1093_v7 = vadd.f32 %v2146_v61, %v1092_v5 }
 0x231   :  { %v1097_v9 = vsel %vm1096_vm11, %v2146_v61, %v1093_v7 }
 0x232   :  { %v1102_v2 = vsel %vm1099_vm12, %v1101_v8, %v1097_v9 }
 0x233   :  { %v1105_v11 = vpack.c.bf16 %v1102_v2, %v1102_v2 }
 0x235   :  { %1259 = vmatmul.bf16.vlgmr.msrb.gmra.mxu3 %v1105_v11 }
 0x2a4   :  { %v1247_v62 = vpop.f32.mrf.mxu1 }
 0x2a5   :  { %v1248_v20 = vadd.f32 %v2127_v18, %v1247_v62 }
 0x2ac   :  { %v1249_v15 = vpop.f32.mrf.mxu1 }
 0x2b8   :  { %v1260_v21 = vpop.f32.mrf.mxu3 }
 0x2b9   :  { %v1261_v22 = vadd.f32 %v1260_v21, %v1248_v20 }
 0x2bb   :  { %v1950_v23 = vmul.f32 -1.442695, %v1261_v22 }
 0x2bd   :  { %2147 = vpow2.f32 %v1950_v23 }
 0x2c0   :  { %v1262_v24 = vpop.f32.mrf.mxu3 }
 0x2c3   :  { %v2148_v25 = vpop.eup %2147 }
 0x2c4   :  { %v1267_v26 = vadd.f32 1.0, %v2148_v25 }
 0x2c6   :  { %2149 = vrcp.f32 %v1267_v26  ;;  %v1279_v30 = vand.u32 2147483648, %v1267_v26  ;;  %v1277_v32 = vand.u32 2147483647, %v1267_v26  ;;  %vm1273_vm14 = vweird.f32 %v1267_v26 }
 0x2c8   :  { %v1280_v10 = vor.u32 1.1754944e-38, %v1279_v30  ;;  %vm1278_vm0 = vcmp.eq.f32.partialorder %v1277_v32, 8.507059e+37 }
 0x2cc   :  { %v2150_v27 = vpop.eup %2149 }
 0x2cd   :  { %v1269_v28 = vmul.f32 %v2150_v27, %v1267_v26  ;;  %vm1274_vm13 = vweird.f32 %v2150_v27 }
 0x2ce   :  { %vm1275_vm15 = vmor %vm1273_vm14, %vm1274_vm13 }
 0x2cf   :  { %v1270_v29 = vsub.f32 1.0, %v1269_v28 }
 0x2d1   :  { %v1271_v31 = vmul.f32 %v2150_v27, %v1270_v29 }
 0x2d3   :  { %v1272_v33 = vadd.f32 %v2150_v27, %v1271_v31 }
 0x2d5   :  { %v1276_v34 = vsel %vm1275_vm15, %v2150_v27, %v1272_v33 }
 0x2d6   :  { %v1281_v35 = vsel %vm1278_vm0, %v1280_v10, %v1276_v34 }
 0x2d7   :  { %v1283_v36 = vpack.c.bf16 %v1281_v35, %v1281_v35 }
 0x2d9   :  { %1360 = vmatmul.bf16.vlgmr.msra.gmra.mxu2 %v1283_v36 }
 0x35c   :  { %v1361_v38 = vpop.f32.mrf.mxu2 }
 0x35d   :  { %v1362_v39 = vadd.f32 %v2128_v37, %v1361_v38 }
 0x35f   :  { %v1983_v40 = vmul.f32 -1.442695, %v1362_v39 }
 0x361   :  { %2151 = vpow2.f32 %v1983_v40 }
 0x364   :  { %v1363_v41 = vpop.f32.mrf.mxu2 }
 0x367   :  { %v2152_v42 = vpop.eup %2151 }
 0x368   :  { %v1368_v43 = vadd.f32 1.0, %v2152_v42 }
 0x36a   :  { %2153 = vrcp.f32 %v1368_v43  ;;  %v1380_v47 = vand.u32 2147483648, %v1368_v43  ;;  %v1378_v49 = vand.u32 2147483647, %v1368_v43  ;;  %vm1374_vm2 = vweird.f32 %v1368_v43 }
 0x36c   :  { %v1381_v52 = vor.u32 1.1754944e-38, %v1380_v47  ;;  %vm1379_vm4 = vcmp.eq.f32.partialorder %v1378_v49, 8.507059e+37 }
 0x370   :  { %v2154_v44 = vpop.eup %2153 }
 0x371   :  { %v1370_v45 = vmul.f32 %v2154_v44, %v1368_v43  ;;  %vm1375_vm1 = vweird.f32 %v2154_v44 }
 0x372   :  { %vm1376_vm3 = vmor %vm1374_vm2, %vm1375_vm1 }
 0x373   :  { %v1371_v46 = vsub.f32 1.0, %v1370_v45 }
 0x375   :  { %v1372_v48 = vmul.f32 %v2154_v44, %v1371_v46 }
 0x377   :  { %v1373_v50 = vadd.f32 %v2154_v44, %v1372_v48 }
 0x379   :  { %v1377_v53 = vsel %vm1376_vm3, %v2154_v44, %v1373_v50 }
 0x37a   :  { %v1382_v54 = vsel %vm1379_vm4, %v1381_v52, %v1377_v53 }
 0x37b   :  { %v1388_v55 = vmul.f32 %v2129_v51, %v1382_v54 }
 0x37d   :  { %1389 = vadd.xlane.f32.xlu0 %v1388_v55 }
 0x3f0   :  { %v1390_v57 = vpop.xlane.xlu0 %1389 }
 0x3f1   :  { %v1395_v58 = vadd.f32 %v2130_v56, %v1390_v57 }
 0x3f3   :  { %v1984_v59 = vmul.f32 -1.442695, %v1395_v58 }
 0x3f5   :  { %2155 = vpow2.f32 %v1984_v59 }
 0x3fb   :  { %v2156_v60 = vpop.eup %2155 }
 0x3fc   :  { %v1399_v61 = vadd.f32 1.0, %v2156_v60 }
 0x3fe   :  { %2157 = vrcp.f32 %v1399_v61  ;;  %v1411_v5 = vand.u32 2147483648, %v1399_v61  ;;  %v1409_v7 = vand.u32 2147483647, %v1399_v61  ;;  %vm1405_vm6 = vweird.f32 %v1399_v61 }
 0x400   :  { %v1412_v9 = vor.u32 1.1754944e-38, %v1411_v5  ;;  %vm1410_vm9 = vcmp.eq.f32.partialorder %v1409_v7, 8.507059e+37 }
 0x404   :  { %v2158_v0 = vpop.eup %2157 }
 0x405   :  { %v1401_v1 = vmul.f32 %v2158_v0, %v1399_v61  ;;  %vm1406_vm5 = vweird.f32 %v2158_v0 }
 0x406   :  { %vm1407_vm8 = vmor %vm1405_vm6, %vm1406_vm5 }
 0x407   :  { %v1402_v4 = vsub.f32 1.0, %v1401_v1 }
 0x409   :  { %v1403_v6 = vmul.f32 %v2158_v0, %v1402_v4 }
 0x40b   :  { %v1404_v8 = vadd.f32 %v2158_v0, %v1403_v6 }
 0x40d   :  { %v1408_v2 = vsel %vm1407_vm8, %v2158_v0, %v1404_v8 }
 0x40e   :  { %v1413_v11 = vsel %vm1410_vm9, %v1412_v9, %v1408_v2 }
 0x40f   :  { %1416 = vst.msk [vmem:[#allocation11] sm:$0xff] %vm1415_vm7, %v1413_v11 }
 0x416   :  { %v1435_v63 = vld [vmem:[#allocation11] sm:$0x3] }
 0x417   :  { %1436 = vst [vmem:[%s2453_s11] sm:$0x3] %v1435_v63 }
 0x418   :  { %1454 = vsyncpa [#allocation4], 1 }
 0x419   :  { %1455 = vsyncpa [#allocation6], 1 }
 0x41a   :  { %1456 = vsyncpa [#allocation9], 1 }

</bundles_post_ra>
